<compile_context>
chip_gen: v7x
topology: tpu7x:2x2x1
jax: 0.10.0
libtpu: 0.0.40
codegen_flags: <defaults>
</compile_context>

<pallas_src>
import functools
import math

import jax
import jax.numpy as jnp
from jax.experimental import pallas as pl
from jax.experimental.pallas import tpu as pltpu


_TARGET_BLOCK_BYTES = 2 * 1024 * 1024  # ~2 MiB output blocks: >=85% of HBM roofline


def _inv_freq(dim):
    # Matches torch: 1 / 10000**(arange(0, dim, 2)/dim), computed once at trace time.
    return 1.0 / (10000.0 ** (jnp.arange(0, dim, 2, dtype=jnp.float32) / dim))


# ----------------------- main (lane-dense, folded) kernel -----------------------

def _rotary_folded_kernel(c_ref, inv_ref, o_ref, *, g, dim):
    """c_ref: (tr, g) coords, inv_ref: (1, g*dim) scaled inv_freq, o_ref: (tr, g*dim)."""
    c = c_ref[...]                                    # (tr, g)
    tr = c.shape[0]
    if g == 1:
        expanded = jnp.broadcast_to(c, (tr, dim))     # (tr, dim), dim % 128 == 0 here
    else:
        # Repeat each coordinate `dim` times along lanes: g broadcasts + one lane
        # concat.  XLU/VPU slots are otherwise idle -> hidden under the HBM write.
        pieces = [jnp.broadcast_to(c[:, a:a + 1], (tr, dim)) for a in range(g)]
        expanded = jnp.concatenate(pieces, axis=-1)   # (tr, g*dim)
    o_ref[...] = expanded * inv_ref[...]              # single VPU mul per element


def _rotary_folded(flat, dim, factor):
    m = flat.shape[0]

    # Minimal fold that makes the output lane-dense (g*dim is a multiple of 128).
    g_base = 128 // math.gcd(dim, 128)
    g = g_base
    # Widen the fold (up to 32 positions) so the coords block rows are wide and the
    # coordinate DMA stays contiguous/cheap; keep an 8-row block within budget.
    while g < 32 and 8 * (2 * g) * dim * 4 <= _TARGET_BLOCK_BYTES:
        g *= 2
    # Prefer a fold that divides m: avoids padding + a wrapper-side output slice copy.
    while g > g_base and m % g != 0:
        g //= 2

    W = g * dim                                       # folded row width, multiple of 128
    m_pad = -(-m // g) * g
    if m_pad != m:
        flat = jnp.pad(flat, (0, m_pad - m))
    M2 = m_pad // g

    coords2 = flat.reshape(M2, g)                     # contiguous HBM reads per block
    inv = _inv_freq(dim) * jnp.float32(factor)        # factor folded in at trace time
    inv_row = jnp.tile(jnp.concatenate([inv, inv]), g)[None, :]     # (1, W), resident

    # Row tile: ~2 MiB output blocks, multiple of 8 sublanes (or the full extent).
    target_rows = max(1, _TARGET_BLOCK_BYTES // (W * 4))
    tr = M2 if M2 <= 8 else max(8, (min(M2, target_rows) // 8) * 8)
    grid = (pl.cdiv(M2, tr),)

    out = pl.pallas_call(
        functools.partial(_rotary_folded_kernel, g=g, dim=dim),
        out_shape=jax.ShapeDtypeStruct((M2, W), jnp.float32),
        grid=grid,
        in_specs=[
            pl.BlockSpec((tr, g), lambda i: (i, 0)),      # coordinates (folded rows)
            pl.BlockSpec((1, W), lambda i: (0, 0)),       # scaled inv_freq row, resident
        ],
        out_specs=pl.BlockSpec((tr, W), lambda i: (i, 0)),
        compiler_params=pltpu.CompilerParams(
            dimension_semantics=("parallel",),            # shard steps across TCs on v7x
        ),
    )(coords2, inv_row)

    out = out.reshape(m_pad, dim)                     # free row-major view of the fold
    if m_pad != m:
        out = out[:m]                                 # only when m % g != 0
    return out


# --------------------- simple fallback kernel (safety net) ----------------------
# Same math without the lane fold.  Only used if the folded kernel fails to lower
# (e.g. a Mosaic version without unaligned lane-concatenate support); it is the
# previously validated structure with larger, dim-scaled row tiles.

def _rotary_simple_kernel(c_ref, inv_ref, o_ref):
    o_ref[...] = c_ref[...] * inv_ref[...]            # (tr, 1) * (1, dim)


def _rotary_simple(flat, dim, factor):
    m = flat.shape[0]
    inv = _inv_freq(dim) * jnp.float32(factor)
    inv_row = jnp.concatenate([inv, inv])[None, :]    # (1, dim)
    t2d = flat.reshape(m, 1)

    target_rows = max(8, _TARGET_BLOCK_BYTES // (dim * 4))
    tr = m if m <= 8 else max(8, (min(m, target_rows) // 8) * 8)
    grid = (pl.cdiv(m, tr),)

    return pl.pallas_call(
        _rotary_simple_kernel,
        out_shape=jax.ShapeDtypeStruct((m, dim), jnp.float32),
        grid=grid,
        in_specs=[
            pl.BlockSpec((tr, 1), lambda i: (i, 0)),
            pl.BlockSpec((1, dim), lambda i: (0, 0)),
        ],
        out_specs=pl.BlockSpec((tr, dim), lambda i: (i, 0)),
        compiler_params=pltpu.CompilerParams(dimension_semantics=("parallel",)),
    )(t2d, inv_row)


# --------------------------------- public API -----------------------------------

def rotary_embedding(coordinates, dim, min_freq=0.5, scale=1.0):
    """Pallas equivalent of RotaryEmbedding(dim, min_freq, scale)(coordinates, device).

    Returns float32 of shape (*coordinates.shape, dim).  (The torch `device`
    argument is placement only and has no JAX equivalent/effect here.)
    """
    assert dim % 2 == 0, "dim must be even"
    coords = jnp.asarray(coordinates, jnp.float32)
    lead = coords.shape
    m = int(math.prod(lead)) if lead else 1
    factor = scale / min_freq

    if m == 0:  # empty input guard (review correctness concern)
        return jnp.zeros((*lead, dim), jnp.float32)

    flat = coords.reshape(m)
    try:
        out = _rotary_folded(flat, dim, factor)
    except Exception:  # pragma: no cover - safety net for older Mosaic lowerings
        out = _rotary_simple(flat, dim, factor)
    return out.reshape(*lead, dim)


def _reference(coords, dim, min_freq=0.5, scale=1.0):
    """Pure-JAX reference mirroring the PyTorch forward."""
    t = jnp.asarray(coords, jnp.float32) * (scale / min_freq)
    inv = _inv_freq(dim)
    freqs = t[..., None] * inv                        # '... i , j -> ... i j'
    return jnp.concatenate([freqs, freqs], axis=-1)


if __name__ == "__main__":
    dim = 32
    min_freq, scale = 0.5, 1.0
    key = jax.random.PRNGKey(0)
    k1, k2 = jax.random.split(key)

    # Case 1: batch=2, seq=8 coordinates (m divides the fold -> no padding path).
    coords1 = jax.random.uniform(k1, (2, 8), jnp.float32) * 16.0
    out1 = jax.block_until_ready(rotary_embedding(coords1, dim, min_freq, scale))
    ref1 = _reference(coords1, dim, min_freq, scale)
    assert out1.shape == (2, 8, dim), out1.shape
    assert out1.dtype == jnp.float32, out1.dtype
    assert jnp.allclose(out1, ref1, atol=1e-5, rtol=1e-5), "mismatch vs reference (case 1)"

    # Case 2: ragged m=21 exercises the pad + slice path.
    coords2 = jax.random.uniform(k2, (3, 7), jnp.float32) * 16.0
    out2 = jax.block_until_ready(rotary_embedding(coords2, dim, min_freq, scale))
    ref2 = _reference(coords2, dim, min_freq, scale)
    assert out2.shape == (3, 7, dim), out2.shape
    assert jnp.allclose(out2, ref2, atol=1e-5, rtol=1e-5), "mismatch vs reference (case 2)"

    print("KERNEL_OK")
</pallas_src>

<mosaic_0001>
module attributes {stable_mosaic.version = 11 : i64} {
  func.func @_rotary_folded_kernel(%arg0: i32, %arg1: memref<1x16xf32, #tpu.memory_space<vmem>>, %arg2: memref<1x512xf32, #tpu.memory_space<vmem>>, %arg3: memref<1x512xf32, #tpu.memory_space<vmem>>) attributes {dimension_semantics = [#tpu.dimension_semantics<parallel>], iteration_bounds = array<i64: 1>, scalar_prefetch = 0 : i64, scratch_operands = 0 : i64, tpu.core_type = #tpu.core_type<tc>, window_params = [{transform_indices = @transform_0, window_bounds = array<i64: 1, 16>}, {pipeline_mode = #tpu.pipeline_mode<synchronous>, transform_indices = @transform_1, window_bounds = array<i64: 1, 512>}, {transform_indices = @transform_2, window_bounds = array<i64: 1, 512>}]} {
    %c0 = arith.constant 0 : index
    %c0_0 = arith.constant 0 : index
    %0 = vector.load %arg1[%c0, %c0_0] : memref<1x16xf32, #tpu.memory_space<vmem>>, vector<1x16xf32>
    %1 = vector.extract_strided_slice %0 {offsets = [0, 0], sizes = [1, 1], strides = [1, 1]} : vector<1x16xf32> to vector<1x1xf32>
    %2 = vector.shape_cast %1 : vector<1x1xf32> to vector<1x1xf32>
    %3 = vector.broadcast %2 : vector<1x1xf32> to vector<1x32xf32>
    %4 = vector.extract_strided_slice %0 {offsets = [0, 1], sizes = [1, 1], strides = [1, 1]} : vector<1x16xf32> to vector<1x1xf32>
    %5 = vector.shape_cast %4 : vector<1x1xf32> to vector<1x1xf32>
    %6 = vector.broadcast %5 : vector<1x1xf32> to vector<1x32xf32>
    %7 = vector.extract_strided_slice %0 {offsets = [0, 2], sizes = [1, 1], strides = [1, 1]} : vector<1x16xf32> to vector<1x1xf32>
    %8 = vector.shape_cast %7 : vector<1x1xf32> to vector<1x1xf32>
    %9 = vector.broadcast %8 : vector<1x1xf32> to vector<1x32xf32>
    %10 = vector.extract_strided_slice %0 {offsets = [0, 3], sizes = [1, 1], strides = [1, 1]} : vector<1x16xf32> to vector<1x1xf32>
    %11 = vector.shape_cast %10 : vector<1x1xf32> to vector<1x1xf32>
    %12 = vector.broadcast %11 : vector<1x1xf32> to vector<1x32xf32>
    %13 = vector.extract_strided_slice %0 {offsets = [0, 4], sizes = [1, 1], strides = [1, 1]} : vector<1x16xf32> to vector<1x1xf32>
    %14 = vector.shape_cast %13 : vector<1x1xf32> to vector<1x1xf32>
    %15 = vector.broadcast %14 : vector<1x1xf32> to vector<1x32xf32>
    %16 = vector.extract_strided_slice %0 {offsets = [0, 5], sizes = [1, 1], strides = [1, 1]} : vector<1x16xf32> to vector<1x1xf32>
    %17 = vector.shape_cast %16 : vector<1x1xf32> to vector<1x1xf32>
    %18 = vector.broadcast %17 : vector<1x1xf32> to vector<1x32xf32>
    %19 = vector.extract_strided_slice %0 {offsets = [0, 6], sizes = [1, 1], strides = [1, 1]} : vector<1x16xf32> to vector<1x1xf32>
    %20 = vector.shape_cast %19 : vector<1x1xf32> to vector<1x1xf32>
    %21 = vector.broadcast %20 : vector<1x1xf32> to vector<1x32xf32>
    %22 = vector.extract_strided_slice %0 {offsets = [0, 7], sizes = [1, 1], strides = [1, 1]} : vector<1x16xf32> to vector<1x1xf32>
    %23 = vector.shape_cast %22 : vector<1x1xf32> to vector<1x1xf32>
    %24 = vector.broadcast %23 : vector<1x1xf32> to vector<1x32xf32>
    %25 = vector.extract_strided_slice %0 {offsets = [0, 8], sizes = [1, 1], strides = [1, 1]} : vector<1x16xf32> to vector<1x1xf32>
    %26 = vector.shape_cast %25 : vector<1x1xf32> to vector<1x1xf32>
    %27 = vector.broadcast %26 : vector<1x1xf32> to vector<1x32xf32>
    %28 = vector.extract_strided_slice %0 {offsets = [0, 9], sizes = [1, 1], strides = [1, 1]} : vector<1x16xf32> to vector<1x1xf32>
    %29 = vector.shape_cast %28 : vector<1x1xf32> to vector<1x1xf32>
    %30 = vector.broadcast %29 : vector<1x1xf32> to vector<1x32xf32>
    %31 = vector.extract_strided_slice %0 {offsets = [0, 10], sizes = [1, 1], strides = [1, 1]} : vector<1x16xf32> to vector<1x1xf32>
    %32 = vector.shape_cast %31 : vector<1x1xf32> to vector<1x1xf32>
    %33 = vector.broadcast %32 : vector<1x1xf32> to vector<1x32xf32>
    %34 = vector.extract_strided_slice %0 {offsets = [0, 11], sizes = [1, 1], strides = [1, 1]} : vector<1x16xf32> to vector<1x1xf32>
    %35 = vector.shape_cast %34 : vector<1x1xf32> to vector<1x1xf32>
    %36 = vector.broadcast %35 : vector<1x1xf32> to vector<1x32xf32>
    %37 = vector.extract_strided_slice %0 {offsets = [0, 12], sizes = [1, 1], strides = [1, 1]} : vector<1x16xf32> to vector<1x1xf32>
    %38 = vector.shape_cast %37 : vector<1x1xf32> to vector<1x1xf32>
    %39 = vector.broadcast %38 : vector<1x1xf32> to vector<1x32xf32>
    %40 = vector.extract_strided_slice %0 {offsets = [0, 13], sizes = [1, 1], strides = [1, 1]} : vector<1x16xf32> to vector<1x1xf32>
    %41 = vector.shape_cast %40 : vector<1x1xf32> to vector<1x1xf32>
    %42 = vector.broadcast %41 : vector<1x1xf32> to vector<1x32xf32>
    %43 = vector.extract_strided_slice %0 {offsets = [0, 14], sizes = [1, 1], strides = [1, 1]} : vector<1x16xf32> to vector<1x1xf32>
    %44 = vector.shape_cast %43 : vector<1x1xf32> to vector<1x1xf32>
    %45 = vector.broadcast %44 : vector<1x1xf32> to vector<1x32xf32>
    %46 = vector.extract_strided_slice %0 {offsets = [0, 15], sizes = [1, 1], strides = [1, 1]} : vector<1x16xf32> to vector<1x1xf32>
    %47 = vector.shape_cast %46 : vector<1x1xf32> to vector<1x1xf32>
    %48 = vector.broadcast %47 : vector<1x1xf32> to vector<1x32xf32>
    %49 = tpu.concatenate %3, %6, %9, %12, %15, %18, %21, %24, %27, %30, %33, %36, %39, %42, %45, %48 in 1 : vector<1x32xf32>, vector<1x32xf32>, vector<1x32xf32>, vector<1x32xf32>, vector<1x32xf32>, vector<1x32xf32>, vector<1x32xf32>, vector<1x32xf32>, vector<1x32xf32>, vector<1x32xf32>, vector<1x32xf32>, vector<1x32xf32>, vector<1x32xf32>, vector<1x32xf32>, vector<1x32xf32>, vector<1x32xf32> -> vector<1x512xf32>
    %c0_1 = arith.constant 0 : index
    %c0_2 = arith.constant 0 : index
    %50 = vector.load %arg2[%c0_1, %c0_2] : memref<1x512xf32, #tpu.memory_space<vmem>>, vector<1x512xf32>
    %51 = arith.mulf %49, %50 : vector<1x512xf32>
    %c0_3 = arith.constant 0 : index
    %c0_4 = arith.constant 0 : index
    %52 = vector.load %arg3[%c0_3, %c0_4] : memref<1x512xf32, #tpu.memory_space<vmem>>, vector<1x512xf32>
    tpu.vector_store %arg3[%c0_3, %c0_4], %51 {strides = array<i32>} : memref<1x512xf32, #tpu.memory_space<vmem>>, vector<1x512xf32>,
    return
  }
  func.func @transform_0(%arg0: i32) -> (i32, i32) {
    %c0_i32 = arith.constant 0 : i32
    %c0_i32_0 = arith.constant 0 : i32
    return %arg0, %c0_i32 : i32, i32
  }
  func.func @transform_1(%arg0: i32) -> (i32, i32) {
    %c0_i32 = arith.constant 0 : i32
    %c0_i32_0 = arith.constant 0 : i32
    %c0_i32_1 = arith.constant 0 : i32
    return %c0_i32, %c0_i32_0 : i32, i32
  }
  func.func @transform_2(%arg0: i32) -> (i32, i32) {
    %c0_i32 = arith.constant 0 : i32
    %c0_i32_0 = arith.constant 0 : i32
    return %arg0, %c0_i32 : i32, i32
  }
}

module attributes {stable_mosaic.version = 11 : i64} {
  func.func @_rotary_simple_kernel(%arg0: i32, %arg1: memref<16x1xf32, #tpu.memory_space<vmem>>, %arg2: memref<1x32xf32, #tpu.memory_space<vmem>>, %arg3: memref<16x32xf32, #tpu.memory_space<vmem>>) attributes {dimension_semantics = [#tpu.dimension_semantics<parallel>], iteration_bounds = array<i64: 1>, scalar_prefetch = 0 : i64, scratch_operands = 0 : i64, tpu.core_type = #tpu.core_type<tc>, window_params = [{transform_indices = @transform_0, window_bounds = array<i64: 16, 1>}, {pipeline_mode = #tpu.pipeline_mode<synchronous>, transform_indices = @transform_1, window_bounds = array<i64: 1, 32>}, {transform_indices = @transform_2, window_bounds = array<i64: 16, 32>}]} {
    %c0 = arith.constant 0 : index
    %c0_0 = arith.constant 0 : index
    %0 = vector.load %arg1[%c0, %c0_0] : memref<16x1xf32, #tpu.memory_space<vmem>>, vector<16x1xf32>
    %c0_1 = arith.constant 0 : index
    %c0_2 = arith.constant 0 : index
    %1 = vector.load %arg2[%c0_1, %c0_2] : memref<1x32xf32, #tpu.memory_space<vmem>>, vector<1x32xf32>
    %2 = vector.broadcast %0 : vector<16x1xf32> to vector<16x32xf32>
    %3 = vector.broadcast %1 : vector<1x32xf32> to vector<16x32xf32>
    %4 = arith.mulf %2, %3 : vector<16x32xf32>
    %c0_3 = arith.constant 0 : index
    %c0_4 = arith.constant 0 : index
    %5 = vector.load %arg3[%c0_3, %c0_4] : memref<16x32xf32, #tpu.memory_space<vmem>>, vector<16x32xf32>
    tpu.vector_store %arg3[%c0_3, %c0_4], %4 {strides = array<i32>} : memref<16x32xf32, #tpu.memory_space<vmem>>, vector<16x32xf32>,
    return
  }
  func.func @transform_0(%arg0: i32) -> (i32, i32) {
    %c0_i32 = arith.constant 0 : i32
    %c0_i32_0 = arith.constant 0 : i32
    return %arg0, %c0_i32 : i32, i32
  }
  func.func @transform_1(%arg0: i32) -> (i32, i32) {
    %c0_i32 = arith.constant 0 : i32
    %c0_i32_0 = arith.constant 0 : i32
    %c0_i32_1 = arith.constant 0 : i32
    return %c0_i32, %c0_i32_0 : i32, i32
  }
  func.func @transform_2(%arg0: i32) -> (i32, i32) {
    %c0_i32 = arith.constant 0 : i32
    %c0_i32_0 = arith.constant 0 : i32
    return %arg0, %c0_i32 : i32, i32
  }
}

</mosaic_0001>

<bundles_post_ra>
// kernel: tpu_custom_call.1
= control target key start
LH: loop header
LB: loop body
LE: loop exit
PB: predicated region body
PF: predicated region fallthrough
CT: control target
= control target key end

     0   :  { %7 = vsyncpa [#allocation3], 0  ;;  %s451_s0 = inlined_call_operand.hbm [shape: f32[1,16], index: 0, kind: input, shape index: {}]   ;;  %s452_s1 = inlined_call_operand.hbm [shape: f32[1,512], index: 1, kind: input, shape index: {}]   ;;  %s453_s2 = inlined_call_operand.hbm [shape: f32[1,512], index: 2, kind: output, shape index: {}]  }
   0x1   :  { %8 = vsyncpa [#allocation6], 0 }
   0x2   :  { %9 = vsyncpa [#allocation4], 0  ;;  %s366_s9 = smov [#allocation2]   ;;  %s367_s11 = smov [#allocation5]  }
   0x3   :  { %s16_s10 = sshll.u32 %s366_s9, 4  ;;  %s26_s12 = sshll.u32 %s367_s11, 4  ;;  %s17_s10 = int_to_ptr.vmem [resolvable:$true] %s16_s10  ;;  %s27_s12 = int_to_ptr.vmem [resolvable:$true] %s26_s12 }
   0x4   :  { %s294_s15 = scalar_lea.hbm %s451_s0, 16 }
   0x5   :  { %p295_p0 = scmp.ne.s32.totalorder %s451_s0, %s294_s15  ;;  %p298_p1 = scmp.lt.u32.totalorder %s294_s15, %s451_s0 }
   0x7   :  { %p300_p2 = pnand %p298_p1, %p295_p0 }
   0x9   :  { %303 = shalt.err (!%p300_p2)
}
   0xa   :  { %s304_s20 = scalar_lea.vmem %s17_s10, 16  ;;  %s308_s21 = scalar_lea.vmem %s17_s10, 32 }
   0xb   :  { %p305_p3 = scmp.ne.s32.totalorder %s17_s10, %s304_s20  ;;  %p309_p4 = scmp.lt.s32.totalorder %s17_s10, %s17_s10 }
   0xc   :  { %p310_p5 = scmp.lt.s32.totalorder %s308_s21, %s304_s20 }
   0xe   :  { %p311_p6 = por %p310_p5, %p309_p4 }
  0x10   :  { %p312_p7 = pnand %p311_p6, %p305_p3 }
  0x12   :  { %315 = shalt.err (!%p312_p7)
}
  0x13   :  { %19 = dma.hbm_to_vmem [thread:$0]  %s451_s0, 16, %s17_s10, [#allocation3]  }
  0x14   :  { %s316_s26 = scalar_lea.hbm %s452_s1, 64 }
  0x15   :  { %p317_p8 = scmp.ne.s32.totalorder %s452_s1, %s316_s26  ;;  %p320_p9 = scmp.lt.u32.totalorder %s316_s26, %s452_s1 }
  0x17   :  { %p322_p10 = pnand %p320_p9, %p317_p8 }
  0x19   :  { %325 = shalt.err (!%p322_p10)
}
  0x1a   :  { %s326_s3 = scalar_lea.vmem %s27_s12, 64  ;;  %p331_p12 = scmp.lt.s32.totalorder %s27_s12, %s27_s12 }
  0x1b   :  { %p327_p11 = scmp.ne.s32.totalorder %s27_s12, %s326_s3  ;;  %p332_p13 = scmp.lt.s32.totalorder %s326_s3, %s326_s3 }
  0x1d   :  { %p333_p0 = por %p332_p13, %p331_p12 }
  0x1f   :  { %p334_p1 = pnand %p333_p0, %p327_p11 }
  0x21   :  { %337 = shalt.err (!%p334_p1)
}
  0x22   :  { %29 = dma.hbm_to_vmem [thread:$0]  %s452_s1, 64, %s27_s12, [#allocation6]  }
  0x23   :  { %360 = dma.done.wait [#allocation3], 16  }
  0x24   :  { %361 = vsyncadd [#allocation3], 4294967280 }
  0x25   :  { %362 = dma.done.wait [#allocation6], 64  }
  0x26   :  { %363 = vsyncadd [#allocation6], 4294967232  ;;  %v368_v0 = vmov 4   ;;  %v369_v1 = vmov 0   ;;  %v36_v2 = vld [vmem:[#allocation2] sm:$0x1]  ;;  %v42_v26 = vlaneseq }
  0x27   :  { %279 = vset.pattern.permute.xlu1 %v368_v0  ;;  %277 = vset.pattern.permute.xlu0 %v369_v1  ;;  %v370_v3 = vmov 5   ;;  %v371_v4 = vmov 1   ;;  %v372_v5 = vmov 8   ;;  %v373_v6 = vmov 9   ;;  %v181_v41 = vld [vmem:[#allocation5] sm:$0xf] }
  0x28   :  { %71 = vperm.xlu1 %279, %v36_v2   ;;  %39 = vperm.xlu0 %277, %v36_v2   ;;  %v374_v7 = vmov 12   ;;  %v375_v8 = vmov 2   ;;  %v376_v9 = vmov 13   ;;  %v377_v10 = vmov 14   ;;  %s385_s1 = smov [#allocation7]  }
  0x29   :  { %v378_v11 = vmov 6   ;;  %v379_v12 = vmov 11   ;;  %v380_v13 = vmov 10   ;;  %v381_v14 = vmov 15   ;;  %s247_s5 = sshll.u32 %s385_s1, 4  ;;  %s248_s5 = int_to_ptr.vmem [resolvable:$true] %s247_s5 }
  0x2a   :  { %v382_v15 = vmov 3   ;;  %v383_v16 = vmov 7   ;;  %v43_v28 = vshrl.u32 %v42_v26, 7  ;;  %vm166_vm0 = vcmask 261120   ;;  %s338_s6 = scalar_lea.vmem %s248_s5, 64  ;;  %p343_p3 = scmp.lt.s32.totalorder %s248_s5, %s248_s5 }
  0x2b   :  { %vm168_vm1 = vcmask 523264   ;;  %vm170_vm2 = vcmask 785408   ;;  %v384_v50 = vmov 1966171168   ;;  %vm238_vm3 = vcmp.lt.s32.totalorder %v42_v26, 512  ;;  %p339_p2 = scmp.ne.s32.totalorder %s248_s5, %s338_s6  ;;  %p344_p4 = scmp.lt.s32.totalorder %s338_s6, %s338_s6 }
  0x2c   :  { %280 = vset.pattern.permute.xlu1 %v370_v3  ;;  %278 = vset.pattern.permute.xlu0 %v371_v4  ;;  %v44_v30 = vsub.s32 0, %v43_v28  ;;  %v193_v36 = vsub.s32 2, %v43_v28  ;;  %v189_v37 = vsub.s32 1, %v43_v28  ;;  %v214_v51 = vunpack.c.l.s4 %v384_v50 }
  0x2d   :  { %79 = vperm.xlu1 %280, %v36_v2   ;;  %47 = vperm.xlu0 %278, %v36_v2   ;;  %v197_v56 = vsub.s32 3, %v43_v28  ;;  %p345_p5 = por %p344_p4, %p343_p3 }
  0x2e   :  { %v186_v46 = vrot.slane %v181_v41, %v44_v30  ;;  %v190_v54 = vrot.slane %v181_v41, %v189_v37  ;;  %v194_v3 = vrot.slane %v181_v41, %v193_v36  ;;  %v215_v4 = vunpack.c.0.s8 %v214_v51 }
  0x2f   :  { %p346_p6 = pnand %p345_p5, %p339_p2 }
  0x31   :  { %281 = vset.pattern.permute.xlu1 %v372_v5  ;;  %282 = vset.pattern.permute.xlu0 %v373_v6  ;;  %v198_v6 = vrot.slane %v181_v41, %v197_v56 }
  0x32   :  { %103 = vperm.xlu1 %281, %v36_v2   ;;  %111 = vperm.xlu0 %282, %v36_v2  }
  0x36   :  { %283 = vset.pattern.permute.xlu1 %v374_v7  ;;  %285 = vset.pattern.permute.xlu0 %v375_v8 }
  0x37   :  { %135 = vperm.xlu1 %283, %v36_v2   ;;  %55 = vperm.xlu0 %285, %v36_v2  }
  0x3b   :  { %284 = vset.pattern.permute.xlu1 %v376_v9  ;;  %288 = vset.pattern.permute.xlu0 %v377_v10 }
  0x3c   :  { %143 = vperm.xlu1 %284, %v36_v2   ;;  %151 = vperm.xlu0 %288, %v36_v2  }
  0x40   :  { %286 = vset.pattern.permute.xlu1 %v378_v11  ;;  %291 = vset.pattern.permute.xlu0 %v379_v12 }
  0x41   :  { %87 = vperm.xlu1 %286, %v36_v2   ;;  %127 = vperm.xlu0 %291, %v36_v2  }
  0x45   :  { %287 = vset.pattern.permute.xlu1 %v380_v13  ;;  %293 = vset.pattern.permute.xlu0 %v381_v14 }
  0x46   :  { %119 = vperm.xlu1 %287, %v36_v2  }
  0x4a   :  { %289 = vset.pattern.permute.xlu1 %v382_v15 }
  0x4b   :  { %63 = vperm.xlu1 %289, %v36_v2  }
  0x4f   :  { %290 = vset.pattern.permute.xlu1 %v383_v16 }
  0x50   :  { %95 = vperm.xlu1 %290, %v36_v2  }
  0x54   :  { %292 = vset.pattern.permute.xlu1 %v381_v14  ;;  %v218_v14 = vsub.s32 %v215_v4, %v43_v28 }
  0x55   :  { %159 = vperm.xlu1 %292, %v36_v2  }
  0xa7   :  { %v72_v17 = vpop.permute.xlu1 %71  ;;  %v40_v20 = vpop.permute.xlu0 %39 }
  0xa8   :  { %v45_v33 = vrot.slane %v40_v20, %v44_v30  ;;  %v77_v42 = vrot.slane %v72_v17, %v44_v30 }
  0xac   :  { %v80_v18 = vpop.permute.xlu1 %79  ;;  %v48_v22 = vpop.permute.xlu0 %47 }
  0xad   :  { %v53_v34 = vrot.slane %v48_v22, %v44_v30  ;;  %v85_v35 = vrot.slane %v80_v18, %v44_v30 }
  0xaf   :  { %v167_v47 = vsel %vm166_vm0, %v45_v33, %v53_v34  ;;  %v172_v53 = vsel %vm166_vm0, %v77_v42, %v85_v35 }
  0xb1   :  { %v104_v19 = vpop.permute.xlu1 %103  ;;  %v112_v24 = vpop.permute.xlu0 %111 }
  0xb2   :  { %v109_v38 = vrot.slane %v104_v19, %v44_v30  ;;  %v117_v39 = vrot.slane %v112_v24, %v44_v30 }
  0xb4   :  { %v175_v57 = vsel %vm166_vm0, %v109_v38, %v117_v39 }
  0xb6   :  { %v136_v21 = vpop.permute.xlu1 %135  ;;  %v56_v27 = vpop.permute.xlu0 %55 }
  0xb7   :  { %v61_v43 = vrot.slane %v56_v27, %v44_v30  ;;  %v141_v58 = vrot.slane %v136_v21, %v44_v30 }
  0xb9   :  { %v169_v61 = vsel %vm168_vm1, %v167_v47, %v61_v43 }
  0xbb   :  { %v144_v23 = vpop.permute.xlu1 %143  ;;  %v152_v31 = vpop.permute.xlu0 %151 }
  0xbc   :  { %v149_v48 = vrot.slane %v144_v23, %v44_v30  ;;  %v157_v62 = vrot.slane %v152_v31, %v44_v30 }
  0xbe   :  { %v178_v1 = vsel %vm166_vm0, %v141_v58, %v149_v48 }
  0xbf   :  { %v179_v10 = vsel %vm168_vm1, %v178_v1, %v157_v62 }
  0xc0   :  { %v88_v25 = vpop.permute.xlu1 %87  ;;  %v128_v45 = vpop.permute.xlu0 %127 }
  0xc1   :  { %v93_v40 = vrot.slane %v88_v25, %v44_v30  ;;  %v133_v60 = vrot.slane %v128_v45, %v44_v30 }
  0xc3   :  { %v173_v59 = vsel %vm168_vm1, %v172_v53, %v93_v40 }
  0xc5   :  { %v120_v29 = vpop.permute.xlu1 %119 }
  0xc6   :  { %v125_v44 = vrot.slane %v120_v29, %v44_v30 }
  0xc8   :  { %v176_v63 = vsel %vm168_vm1, %v175_v57, %v125_v44 }
  0xc9   :  { %v177_v8 = vsel %vm170_vm2, %v176_v63, %v133_v60 }
  0xca   :  { %v64_v32 = vpop.permute.xlu1 %63  ;;  %v205_v13 = vmul.f32 %v194_v3, %v177_v8 }
  0xcb   :  { %v69_v49 = vrot.slane %v64_v32, %v44_v30 }
  0xcd   :  { %v171_v2 = vsel %vm170_vm2, %v169_v61, %v69_v49 }
  0xce   :  { %v203_v11 = vmul.f32 %v186_v46, %v171_v2 }
  0xcf   :  { %v96_v52 = vpop.permute.xlu1 %95 }
  0xd0   :  { %v101_v55 = vrot.slane %v96_v52, %v44_v30 }
  0xd2   :  { %v174_v0 = vsel %vm170_vm2, %v173_v59, %v101_v55 }
  0xd3   :  { %v204_v5 = vmul.f32 %v190_v54, %v174_v0 }
  0xd4   :  { %v160_v7 = vpop.permute.xlu1 %159 }
  0xd5   :  { %v165_v9 = vrot.slane %v160_v7, %v44_v30  ;;  %v211_v15 = vcombine.low %v203_v11, %v204_v5 }
  0xd7   :  { %v180_v12 = vsel %vm170_vm2, %v179_v10, %v165_v9  ;;  %v219_v18 = vrot.slane %v211_v15, %v218_v14 }
  0xd8   :  { %v206_v16 = vmul.f32 %v198_v6, %v180_v12 }
  0xda   :  { %v212_v17 = vcombine.low %v205_v13, %v206_v16 }
  0xdc   :  { %v226_v19 = vrot.slane %v212_v17, %v218_v14 }
  0xde   :  { %v227_v20 = vcombine.low %v219_v18, %v226_v19 }
  0xe0   :  { %v234_v21 = vrot.slane %v227_v20, %v218_v14 }
  0xe2   :  { %240 = vst.msk [vmem:[#allocation7] sm:$0xf] %vm238_vm3, %v234_v21 }
  0xe3   :  { %349 = shalt.err (!%p346_p6)
}
  0xe4   :  { %s350_s9 = scalar_lea.hbm %s453_s2, 64 }
  0xe5   :  { %p351_p7 = scmp.ne.s32.totalorder %s453_s2, %s350_s9  ;;  %p354_p8 = scmp.lt.u32.totalorder %s350_s9, %s453_s2 }
  0xe7   :  { %p356_p9 = pnand %p354_p8, %p351_p7 }
  0xe9   :  { %359 = shalt.err (!%p356_p9)
}
  0xea   :  { %250 = dma.vmem_to_hbm [thread:$0]  %s248_s5, 64, %s453_s2, [#allocation4]  }
  0xeb   :  { %364 = dma.done.wait [#allocation4], 64  }
  0xec   :  { %365 = vsyncadd [#allocation4], 4294967232 }
  0xed   :  { %254 = vsyncpa [#allocation3], 1 }
  0xee   :  { %255 = vsyncpa [#allocation6], 1 }
  0xef   :  { %256 = vsyncpa [#allocation4], 1 }

// kernel: tpu_custom_call.1
= control target key start
LH: loop header
LB: loop body
LE: loop exit
PB: predicated region body
PF: predicated region fallthrough
CT: control target
= control target key end

     0   :  { %v82_v1 = vmov 0   ;;  %s122_s0 = inlined_call_operand.vmem [shape: f32[16,1], index: 0, kind: input, shape index: {}]   ;;  %s123_s1 = inlined_call_operand.vmem [shape: f32[1,32], index: 1, kind: input, shape index: {}]   ;;  %s124_s2 = inlined_call_operand.hbm [shape: f32[16,32], index: 2, kind: output, shape index: {}]  }
   0x1   :  { %v12_v0 = vld [vmem:[%s122_s0] sm:$0xff]  ;;  %57 = vset.pattern.permute.xlu0 %v82_v1 }
   0x2   :  { %7 = vsyncpa [#allocation3], 0  ;;  %17 = vperm.xlu0 %57, %v12_v0   ;;  %v13_v2 = vld [vmem:[%s122_s0 + $0x8] sm:$0xff]  ;;  %v52_v3 = vld [vmem:[%s123_s1] ss:$0 sm:$0xff]  ;;  %vm33_vm0 = vcmask 261120  }
   0x3   :  { %s83_s15 = smov [#allocation2]  }
   0x4   :  { %s41_s16 = sshll.u32 %s83_s15, 4  ;;  %s42_s16 = int_to_ptr.vmem [resolvable:$true] %s41_s16 }
   0x5   :  { %s58_s17 = scalar_lea.vmem %s42_s16, 256  ;;  %p63_p1 = scmp.lt.s32.totalorder %s42_s16, %s42_s16 }
   0x6   :  { %22 = vperm.xlu0 %57, %v13_v2   ;;  %p59_p0 = scmp.ne.s32.totalorder %s42_s16, %s58_s17  ;;  %p64_p2 = scmp.lt.s32.totalorder %s58_s17, %s58_s17 }
   0x8   :  { %p65_p3 = por %p64_p2, %p63_p1 }
   0xa   :  { %p66_p4 = pnand %p65_p3, %p59_p0 }
  0x81   :  { %v18_v4 = vpop.permute.xlu0 %17 }
  0x82   :  { %v31_v5 = vmul.f32 %v52_v3, %v18_v4 }
  0x84   :  { %34 = vst.msk [vmem:[#allocation2] sm:$0xff] %vm33_vm0, %v31_v5 }
  0x85   :  { %v23_v6 = vpop.permute.xlu0 %22 }
  0x86   :  { %v32_v7 = vmul.f32 %v52_v3, %v23_v6 }
  0x88   :  { %35 = vst.msk [vmem:[#allocation2 + $0x8] sm:$0xff] %vm33_vm0, %v32_v7 }
  0x89   :  { %69 = shalt.err (!%p66_p4)
}
  0x8a   :  { %s70_s1 = scalar_lea.hbm %s124_s2, 256 }
  0x8b   :  { %p71_p5 = scmp.ne.s32.totalorder %s124_s2, %s70_s1  ;;  %p74_p6 = scmp.lt.u32.totalorder %s70_s1, %s124_s2 }
  0x8d   :  { %p76_p7 = pnand %p74_p6, %p71_p5 }
  0x8f   :  { %79 = shalt.err (!%p76_p7)
}
  0x90   :  { %s84_s23 = smov 128   ;;  %s85_s24 = smov 8  }
  0x91   :  { %47 = dma.vmem_to_hbm [thread:$0]  %s42_s16, 256, %s124_s2, [#allocation3], %s84_s23, %s84_s23, %s85_s24  }
  0x92   :  { %80 = dma.done.wait [#allocation3], 256  }
  0x93   :  { %81 = vsyncadd [#allocation3], 4294967040 }
  0x94   :  { %51 = vsyncpa [#allocation3], 1 }

</bundles_post_ra>
